<compile_context>
chip_gen: v6e
topology: v6e:2x2x1
jax: 0.10.0
libtpu: 0.0.40
codegen_flags: <defaults>
</compile_context>

<pallas_src>
import functools

import jax
import jax.numpy as jnp
from jax.experimental import pallas as pl
from jax.experimental.pallas import tpu as pltpu


def _dilated_cnn_kernel(x_ref, w1_ref, b1_ref, wtap_ref, bstack_ref, feat_ref,
                        *, depth, seq_len):
    """One grid step over M = batch_block*seq_len flattened (batch, pos) rows.

    x_ref:      (M, n_in)          f32   input rows
    w1_ref:     (n_in, Hp)         bf16  conv_1 weight (transposed, lane-padded)
    b1_ref:     (1, Hp)            f32   conv_1 bias
    wtap_ref:   (depth, Hp, 3*Hp)  bf16  fused dilated-conv weights
                                         (cols: tap l-d | tap l | tap l+d)
    bstack_ref: (depth, 1, Hp)     f32   dilated-conv biases
    feat_ref:   (M, Hp)            f32   output feature map (lane-padded)
    """
    M, Hp = feat_ref.shape
    cdt = w1_ref.dtype                       # MXU compute dtype (bf16)

    # conv_1: (1, n_in) kernel over width == per-position linear projection.
    h0 = (jnp.dot(x_ref[...].astype(cdt), w1_ref[...],
                  preferred_element_type=jnp.float32)
          + b1_ref[...])                     # (M, Hp) f32

    # Position of each row inside its sequence (sequences are contiguous in
    # M).  Hoisted once; the per-dilation masks both implement the conv's zero
    # padding and stop taps bleeding across batch elements packed along M.
    pos = jax.lax.broadcasted_iota(jnp.int32, (M, Hp), 0) % seq_len
    up_ok = [pos >= (1 << i) for i in range(depth)]
    dn_ok = [pos < seq_len - (1 << i) for i in range(depth)]

    def block_body(_, carry):
        feat, cur = carry
        for i in range(depth):               # static: per-level weights/dilation
            d = 1 << i
            # One MXU pass for all three taps: z[:, k*Hp:(k+1)*Hp] = cur @ W_k.
            z = jnp.dot(cur.astype(cdt), wtap_ref[i],
                        preferred_element_type=jnp.float32)     # (M, 3*Hp)
            z_up, z_mid, z_dn = z[:, :Hp], z[:, Hp:2 * Hp], z[:, 2 * Hp:]
            zeros_d = jnp.zeros((d, Hp), jnp.float32)
            # up[r] = (cur @ W_{l-d})[r-d], zero outside the sequence.
            up = jnp.where(up_ok[i],
                           jnp.concatenate([zeros_d, z_up[:M - d]], axis=0),
                           0.0)
            # dn[r] = (cur @ W_{l+d})[r+d], zero outside the sequence.
            dn = jnp.where(dn_ok[i],
                           jnp.concatenate([z_dn[d:], zeros_d], axis=0),
                           0.0)
            y = up + z_mid + dn + bstack_ref[i]
            cur = jnp.maximum(y, 0.0)        # ReLU; dropout == identity (eval)
        return feat + cur, cur

    feat, _ = jax.lax.fori_loop(0, depth, block_body, (h0, h0))
    feat_ref[...] = feat


def dilated_cnn_forward(x, w1, b1, wstack, bstack, *, depth,
                        compute_dtype=jnp.bfloat16, batch_block=None):
    """x: (B, L, n_in) float32.  Returns (B, 1, L, H) float32."""
    B, L, n_in = x.shape
    H = w1.shape[1]
    assert wstack.shape == (depth, 3, H, H)
    assert (1 << (depth - 1)) < L, "largest dilation must be < seq_len"

    # Lane padding: exact (zero rows/cols), sliced off in the wrapper.
    Hp = ((H + 127) // 128) * 128
    ph = Hp - H

    # conv_1 weight/bias, lane-padded; MXU operands in bf16.
    w1_p = jnp.pad(w1, ((0, 0), (0, ph))).astype(compute_dtype)       # (n_in,Hp)
    b1_p = jnp.pad(b1.astype(jnp.float32), ((0, 0), (0, ph)))         # (1, Hp)

    # Tap fusion along the OUTPUT dim: (depth,3,H,H) -> (depth, Hp, 3*Hp) so a
    # single matmul per level produces [cur@W_{l-d} | cur@W_l | cur@W_{l+d}].
    w_pad = jnp.pad(wstack, ((0, 0), (0, 0), (0, ph), (0, ph)))       # (d,3,Hp,Hp)
    w_tap = (jnp.transpose(w_pad, (0, 2, 1, 3))
             .reshape(depth, Hp, 3 * Hp).astype(compute_dtype))
    b_pad = jnp.pad(bstack.astype(jnp.float32), ((0, 0), (0, 0), (0, ph)))

    # Batch tiling: flatten (TB, L) -> M = TB*L rows per grid step.  Keep a
    # 2-way parallel grid when possible so both v7x TensorCores are used
    # (near-neutral on single-TC v5e/v6e).
    if batch_block is None:
        if B % 2 == 0 and ((B // 2) * L) % 8 == 0:
            batch_block = B // 2
        else:
            batch_block = B
    assert B % batch_block == 0, "batch_block must divide B"
    num_blocks = B // batch_block
    M = batch_block * L
    assert num_blocks == 1 or M % 8 == 0, "row block must be sublane aligned"

    x2 = x.reshape(B * L, n_in)

    kernel = functools.partial(_dilated_cnn_kernel, depth=depth, seq_len=L)

    # Advisory cost + explicit VMEM budget (generous headroom, capped for
    # v7x's 64 MiB VMEM).  TODO(synk): for production L, tile L with a
    # 2**(depth-1) halo instead of keeping whole sequences per block.
    w_itemsize = jnp.dtype(compute_dtype).itemsize
    flops = 2 * B * L * (n_in * Hp + depth * depth * 3 * Hp * Hp)
    bytes_accessed = (B * L * n_in * 4 + B * L * Hp * 4
                      + (n_in * Hp + depth * 3 * Hp * Hp) * w_itemsize
                      + (Hp + depth * Hp) * 4)
    vmem_est = (14 * M * Hp * 4                      # live f32 activations
                + 2 * (M * n_in * 4 + M * Hp * 4)    # double-buffered I/O blocks
                + 2 * (n_in * Hp + depth * 3 * Hp * Hp) * w_itemsize
                + 2 * (Hp + depth * Hp) * 4)
    vmem_limit = int(min(max(8 * vmem_est, 32 * 2**20), 64 * 2**20))

    feat = pl.pallas_call(
        kernel,
        out_shape=jax.ShapeDtypeStruct((B * L, Hp), jnp.float32),
        grid=(num_blocks,),
        in_specs=[
            pl.BlockSpec((M, n_in), lambda b: (b, 0)),
            pl.BlockSpec((n_in, Hp), lambda b: (0, 0)),
            pl.BlockSpec((1, Hp), lambda b: (0, 0)),
            pl.BlockSpec((depth, Hp, 3 * Hp), lambda b: (0, 0, 0)),
            pl.BlockSpec((depth, 1, Hp), lambda b: (0, 0, 0)),
        ],
        out_specs=pl.BlockSpec((M, Hp), lambda b: (b, 0)),
        compiler_params=pltpu.CompilerParams(
            dimension_semantics=("parallel",),
            vmem_limit_bytes=vmem_limit),
        cost_estimate=pl.CostEstimate(flops=flops, transcendentals=0,
                                      bytes_accessed=bytes_accessed),
    )(x2, w1_p, b1_p, w_tap, b_pad)
    return feat[:, :H].reshape(B, 1, L, H)


def dilated_cnn_reference(x, w1, b1, wstack, bstack, *, depth,
                          compute_dtype=jnp.bfloat16):
    """Plain-JAX reference of the same math (mirrors the kernel's bf16 MXU
    operands / f32 accumulation so the self-check is apples-to-apples)."""
    B, L, _ = x.shape
    H = w1.shape[1]
    cdt = compute_dtype
    w1c = w1.astype(cdt)
    wc = wstack.astype(cdt)
    h0 = jnp.einsum("bln,nh->blh", x.astype(cdt), w1c,
                    preferred_element_type=jnp.float32) + b1
    feat = h0
    cur = h0
    for _ in range(depth):
        for i in range(depth):
            d = 2 ** i
            up = jnp.pad(cur, ((0, 0), (d, 0), (0, 0)))[:, :L, :]
            dn = jnp.pad(cur, ((0, 0), (0, d), (0, 0)))[:, d:, :]
            y = (jnp.einsum("blh,hk->blk", up.astype(cdt), wc[i, 0],
                            preferred_element_type=jnp.float32)
                 + jnp.einsum("blh,hk->blk", cur.astype(cdt), wc[i, 1],
                              preferred_element_type=jnp.float32)
                 + jnp.einsum("blh,hk->blk", dn.astype(cdt), wc[i, 2],
                              preferred_element_type=jnp.float32)
                 + bstack[i])
            cur = jnp.maximum(y, 0.0)
        feat = feat + cur
    return feat.reshape(B, 1, L, H)


if __name__ == "__main__":
    # Small, deterministic configuration.
    B, L, N_IN, HIDDEN, DEPTH = 2, 16, 8, 32, 2

    key = jax.random.PRNGKey(0)
    k_x, k_w1, k_b1, k_ws, k_bs = jax.random.split(key, 5)

    x = jax.random.normal(k_x, (B, L, N_IN), dtype=jnp.float32)

    # conv_1: torch weight (H, 1, 1, n_in) -> stored transposed as (n_in, H).
    w1 = (jax.random.normal(k_w1, (N_IN, HIDDEN), dtype=jnp.float32)
          * (1.0 / N_IN ** 0.5))
    b1 = jax.random.normal(k_b1, (1, HIDDEN), dtype=jnp.float32) * 0.1

    # dilated convs: torch weight (H, 1, 3, H) -> per tap k the (H_in, H_out)
    # matrix W[:, 0, k, :].T, stacked as (depth, 3, H, H).
    wstack = (jax.random.normal(k_ws, (DEPTH, 3, HIDDEN, HIDDEN),
                                dtype=jnp.float32)
              * (1.0 / (3 * HIDDEN) ** 0.5))
    bstack = jax.random.normal(k_bs, (DEPTH, 1, HIDDEN),
                               dtype=jnp.float32) * 0.1

    out = dilated_cnn_forward(x, w1, b1, wstack, bstack, depth=DEPTH)
    out = jax.block_until_ready(out)

    ref = dilated_cnn_reference(x, w1, b1, wstack, bstack, depth=DEPTH)
    ref = jax.block_until_ready(ref)

    assert out.shape == (B, 1, L, HIDDEN), out.shape
    max_err = float(jnp.max(jnp.abs(out - ref)))
    assert jnp.allclose(out, ref, atol=2e-2, rtol=2e-2), max_err

    print("KERNEL_OK")
</pallas_src>

<mosaic_0001>
module attributes {stable_mosaic.version = 11 : i64} {
  func.func @_dilated_cnn_kernel(%arg0: i32, %arg1: memref<16x8xf32, #tpu.memory_space<vmem>>, %arg2: memref<8x128xbf16, #tpu.memory_space<vmem>>, %arg3: memref<1x128xf32, #tpu.memory_space<vmem>>, %arg4: memref<2x128x384xbf16, #tpu.memory_space<vmem>>, %arg5: memref<2x1x128xf32, #tpu.memory_space<vmem>>, %arg6: memref<16x128xf32, #tpu.memory_space<vmem>>) attributes {dimension_semantics = [#tpu.dimension_semantics<parallel>], iteration_bounds = array<i64: 2>, scalar_prefetch = 0 : i64, scratch_operands = 0 : i64, tpu.core_type = #tpu.core_type<tc>, window_params = [{transform_indices = @transform_0, window_bounds = array<i64: 16, 8>}, {pipeline_mode = #tpu.pipeline_mode<synchronous>, transform_indices = @transform_1, window_bounds = array<i64: 8, 128>}, {pipeline_mode = #tpu.pipeline_mode<synchronous>, transform_indices = @transform_2, window_bounds = array<i64: 1, 128>}, {pipeline_mode = #tpu.pipeline_mode<synchronous>, transform_indices = @transform_3, window_bounds = array<i64: 2, 128, 384>}, {pipeline_mode = #tpu.pipeline_mode<synchronous>, transform_indices = @transform_4, window_bounds = array<i64: 2, 1, 128>}, {transform_indices = @transform_5, window_bounds = array<i64: 16, 128>}]} {
    %c0 = arith.constant 0 : index
    %c0_0 = arith.constant 0 : index
    %0 = vector.load %arg1[%c0, %c0_0] : memref<16x8xf32, #tpu.memory_space<vmem>>, vector<16x8xf32>
    %1 = arith.truncf %0 : vector<16x8xf32> to vector<16x8xbf16>
    %c0_1 = arith.constant 0 : index
    %c0_2 = arith.constant 0 : index
    %2 = vector.load %arg2[%c0_1, %c0_2] : memref<8x128xbf16, #tpu.memory_space<vmem>>, vector<8x128xbf16>
    %cst = arith.constant dense<0.000000e+00> : vector<16x128xf32>
    %3 = tpu.matmul %1, %2, %cst {dimension_numbers = #tpu.dot_dimension_numbers<[1], [0], [0], [1], [0, 0, 1, 1], [], []>} : vector<16x8xbf16>, vector<8x128xbf16>, vector<16x128xf32> -> vector<16x128xf32>
    %c0_3 = arith.constant 0 : index
    %c0_4 = arith.constant 0 : index
    %4 = vector.load %arg3[%c0_3, %c0_4] : memref<1x128xf32, #tpu.memory_space<vmem>>, vector<1x128xf32>
    %5 = vector.broadcast %4 : vector<1x128xf32> to vector<16x128xf32>
    %6 = arith.addf %3, %5 : vector<16x128xf32>
    %7 = tpu.iota {dimensions = array<i32: 0>} : vector<16x128xi32>
    %c16_i32 = arith.constant 16 : i32
    %c0_i32 = arith.constant 0 : i32
    %8 = arith.cmpi eq, %c16_i32, %c0_i32 : i32
    %c1_i32 = arith.constant 1 : i32
    %9 = arith.select %8, %c1_i32, %c16_i32 : i32
    %10 = vector.broadcast %9 : i32 to vector<16x128xi32>
    %11 = arith.remsi %7, %10 : vector<16x128xi32>
    %c0_i32_5 = arith.constant 0 : i32
    %12 = vector.broadcast %c0_i32_5 : i32 to vector<16x128xi32>
    %13 = arith.cmpi ne, %11, %12 : vector<16x128xi32>
    %c0_i32_6 = arith.constant 0 : i32
    %14 = vector.broadcast %c0_i32_6 : i32 to vector<16x128xi32>
    %15 = arith.cmpi slt, %11, %14 : vector<16x128xi32>
    %c0_i32_7 = arith.constant 0 : i32
    %16 = arith.cmpi slt, %9, %c0_i32_7 : i32
    %17 = vector.broadcast %16 : i1 to vector<16x128xi1>
    %18 = vector.broadcast %17 : vector<16x128xi1> to vector<16x128xi1>
    %19 = arith.xori %15, %18 : vector<16x128xi1>
    %20 = arith.andi %19, %13 : vector<16x128xi1>
    %21 = vector.broadcast %9 : i32 to vector<16x128xi32>
    %22 = arith.addi %11, %21 : vector<16x128xi32>
    %23 = arith.select %20, %22, %11 : vector<16x128xi1>, vector<16x128xi32>
    %c1_i32_8 = arith.constant 1 : i32
    %24 = vector.broadcast %c1_i32_8 : i32 to vector<16x128xi32>
    %25 = arith.cmpi sge, %23, %24 : vector<16x128xi32>
    %c2_i32 = arith.constant 2 : i32
    %26 = vector.broadcast %c2_i32 : i32 to vector<16x128xi32>
    %27 = arith.cmpi sge, %23, %26 : vector<16x128xi32>
    %c15_i32 = arith.constant 15 : i32
    %28 = vector.broadcast %c15_i32 : i32 to vector<16x128xi32>
    %29 = arith.cmpi slt, %23, %28 : vector<16x128xi32>
    %c14_i32 = arith.constant 14 : i32
    %30 = vector.broadcast %c14_i32 : i32 to vector<16x128xi32>
    %31 = arith.cmpi slt, %23, %30 : vector<16x128xi32>
    %c0_i32_9 = arith.constant 0 : i32
    %c2_i32_10 = arith.constant 2 : i32
    %32 = arith.addi %c0_i32_9, %c2_i32_10 : i32
    %c1_i32_11 = arith.constant 1 : i32
    %33:2 = scf.for %arg7 = %c0_i32_9 to %32 step %c1_i32_11 iter_args(%arg8 = %6, %arg9 = %6) -> (vector<16x128xf32>, vector<16x128xf32>)  : i32 {
      %35 = arith.truncf %arg9 : vector<16x128xf32> to vector<16x128xbf16>
      %c0_14 = arith.constant 0 : index
      %c0_15 = arith.constant 0 : index
      %c0_16 = arith.constant 0 : index
      %36 = vector.load %arg4[%c0_14, %c0_15, %c0_16] : memref<2x128x384xbf16, #tpu.memory_space<vmem>>, vector<1x128x384xbf16>
      %37 = vector.shape_cast %36 : vector<1x128x384xbf16> to vector<128x384xbf16>
      %cst_17 = arith.constant dense<0.000000e+00> : vector<16x384xf32>
      %38 = tpu.matmul %35, %37, %cst_17 {dimension_numbers = #tpu.dot_dimension_numbers<[1], [0], [0], [1], [0, 0, 1, 1], [], []>} : vector<16x128xbf16>, vector<128x384xbf16>, vector<16x384xf32> -> vector<16x384xf32>
      %39 = vector.extract_strided_slice %38 {offsets = [0, 0], sizes = [16, 128], strides = [1, 1]} : vector<16x384xf32> to vector<16x128xf32>
      %40 = vector.extract_strided_slice %38 {offsets = [0, 128], sizes = [16, 128], strides = [1, 1]} : vector<16x384xf32> to vector<16x128xf32>
      %41 = vector.extract_strided_slice %38 {offsets = [0, 256], sizes = [16, 128], strides = [1, 1]} : vector<16x384xf32> to vector<16x128xf32>
      %cst_18 = arith.constant 0.000000e+00 : f32
      %42 = vector.broadcast %cst_18 : f32 to vector<1x128xf32>
      %43 = vector.extract_strided_slice %39 {offsets = [0, 0], sizes = [15, 128], strides = [1, 1]} : vector<16x128xf32> to vector<15x128xf32>
      %44 = tpu.concatenate %42, %43 in 0 : vector<1x128xf32>, vector<15x128xf32> -> vector<16x128xf32>
      %cst_19 = arith.constant 0.000000e+00 : f32
      %45 = vector.broadcast %cst_19 : f32 to vector<16x128xf32>
      %46 = arith.select %25, %44, %45 : vector<16x128xi1>, vector<16x128xf32>
      %47 = vector.extract_strided_slice %41 {offsets = [1, 0], sizes = [15, 128], strides = [1, 1]} : vector<16x128xf32> to vector<15x128xf32>
      %48 = tpu.concatenate %47, %42 in 0 : vector<15x128xf32>, vector<1x128xf32> -> vector<16x128xf32>
      %cst_20 = arith.constant 0.000000e+00 : f32
      %49 = vector.broadcast %cst_20 : f32 to vector<16x128xf32>
      %50 = arith.select %29, %48, %49 : vector<16x128xi1>, vector<16x128xf32>
      %51 = arith.addf %46, %40 : vector<16x128xf32>
      %52 = arith.addf %51, %50 : vector<16x128xf32>
      %c0_21 = arith.constant 0 : index
      %c0_22 = arith.constant 0 : index
      %c0_23 = arith.constant 0 : index
      %53 = vector.load %arg5[%c0_21, %c0_22, %c0_23] : memref<2x1x128xf32, #tpu.memory_space<vmem>>, vector<1x1x128xf32>
      %54 = vector.shape_cast %53 : vector<1x1x128xf32> to vector<1x128xf32>
      %55 = vector.broadcast %54 : vector<1x128xf32> to vector<16x128xf32>
      %56 = arith.addf %52, %55 : vector<16x128xf32>
      %cst_24 = arith.constant 0.000000e+00 : f32
      %57 = vector.broadcast %cst_24 : f32 to vector<16x128xf32>
      %58 = arith.maximumf %56, %57 : vector<16x128xf32>
      %59 = arith.truncf %58 : vector<16x128xf32> to vector<16x128xbf16>
      %c1 = arith.constant 1 : index
      %c0_25 = arith.constant 0 : index
      %c0_26 = arith.constant 0 : index
      %60 = vector.load %arg4[%c1, %c0_25, %c0_26] : memref<2x128x384xbf16, #tpu.memory_space<vmem>>, vector<1x128x384xbf16>
      %61 = vector.shape_cast %60 : vector<1x128x384xbf16> to vector<128x384xbf16>
      %cst_27 = arith.constant dense<0.000000e+00> : vector<16x384xf32>
      %62 = tpu.matmul %59, %61, %cst_27 {dimension_numbers = #tpu.dot_dimension_numbers<[1], [0], [0], [1], [0, 0, 1, 1], [], []>} : vector<16x128xbf16>, vector<128x384xbf16>, vector<16x384xf32> -> vector<16x384xf32>
      %63 = vector.extract_strided_slice %62 {offsets = [0, 0], sizes = [16, 128], strides = [1, 1]} : vector<16x384xf32> to vector<16x128xf32>
      %64 = vector.extract_strided_slice %62 {offsets = [0, 128], sizes = [16, 128], strides = [1, 1]} : vector<16x384xf32> to vector<16x128xf32>
      %65 = vector.extract_strided_slice %62 {offsets = [0, 256], sizes = [16, 128], strides = [1, 1]} : vector<16x384xf32> to vector<16x128xf32>
      %cst_28 = arith.constant 0.000000e+00 : f32
      %66 = vector.broadcast %cst_28 : f32 to vector<2x128xf32>
      %67 = vector.extract_strided_slice %63 {offsets = [0, 0], sizes = [14, 128], strides = [1, 1]} : vector<16x128xf32> to vector<14x128xf32>
      %68 = tpu.concatenate %66, %67 in 0 : vector<2x128xf32>, vector<14x128xf32> -> vector<16x128xf32>
      %cst_29 = arith.constant 0.000000e+00 : f32
      %69 = vector.broadcast %cst_29 : f32 to vector<16x128xf32>
      %70 = arith.select %27, %68, %69 : vector<16x128xi1>, vector<16x128xf32>
      %71 = vector.extract_strided_slice %65 {offsets = [2, 0], sizes = [14, 128], strides = [1, 1]} : vector<16x128xf32> to vector<14x128xf32>
      %72 = tpu.concatenate %71, %66 in 0 : vector<14x128xf32>, vector<2x128xf32> -> vector<16x128xf32>
      %cst_30 = arith.constant 0.000000e+00 : f32
      %73 = vector.broadcast %cst_30 : f32 to vector<16x128xf32>
      %74 = arith.select %31, %72, %73 : vector<16x128xi1>, vector<16x128xf32>
      %75 = arith.addf %70, %64 : vector<16x128xf32>
      %76 = arith.addf %75, %74 : vector<16x128xf32>
      %c1_31 = arith.constant 1 : index
      %c0_32 = arith.constant 0 : index
      %c0_33 = arith.constant 0 : index
      %77 = vector.load %arg5[%c1_31, %c0_32, %c0_33] : memref<2x1x128xf32, #tpu.memory_space<vmem>>, vector<1x1x128xf32>
      %78 = vector.shape_cast %77 : vector<1x1x128xf32> to vector<1x128xf32>
      %79 = vector.broadcast %78 : vector<1x128xf32> to vector<16x128xf32>
      %80 = arith.addf %76, %79 : vector<16x128xf32>
      %cst_34 = arith.constant 0.000000e+00 : f32
      %81 = vector.broadcast %cst_34 : f32 to vector<16x128xf32>
      %82 = arith.maximumf %80, %81 : vector<16x128xf32>
      %83 = arith.addf %arg8, %82 : vector<16x128xf32>
      scf.yield %83, %82 : vector<16x128xf32>, vector<16x128xf32>
    }
    %c0_12 = arith.constant 0 : index
    %c0_13 = arith.constant 0 : index
    %34 = vector.load %arg6[%c0_12, %c0_13] : memref<16x128xf32, #tpu.memory_space<vmem>>, vector<16x128xf32>
    tpu.vector_store %arg6[%c0_12, %c0_13], %33#0 {strides = array<i32>} : memref<16x128xf32, #tpu.memory_space<vmem>>, vector<16x128xf32>,
    return
  }
  func.func @transform_0(%arg0: i32) -> (i32, i32) {
    %c0_i32 = arith.constant 0 : i32
    %c0_i32_0 = arith.constant 0 : i32
    return %arg0, %c0_i32 : i32, i32
  }
  func.func @transform_1(%arg0: i32) -> (i32, i32) {
    %c0_i32 = arith.constant 0 : i32
    %c0_i32_0 = arith.constant 0 : i32
    %c0_i32_1 = arith.constant 0 : i32
    return %c0_i32, %c0_i32_0 : i32, i32
  }
  func.func @transform_2(%arg0: i32) -> (i32, i32) {
    %c0_i32 = arith.constant 0 : i32
    %c0_i32_0 = arith.constant 0 : i32
    %c0_i32_1 = arith.constant 0 : i32
    return %c0_i32, %c0_i32_0 : i32, i32
  }
  func.func @transform_3(%arg0: i32) -> (i32, i32, i32) {
    %c0_i32 = arith.constant 0 : i32
    %c0_i32_0 = arith.constant 0 : i32
    %c0_i32_1 = arith.constant 0 : i32
    %c0_i32_2 = arith.constant 0 : i32
    return %c0_i32, %c0_i32_0, %c0_i32_1 : i32, i32, i32
  }
  func.func @transform_4(%arg0: i32) -> (i32, i32, i32) {
    %c0_i32 = arith.constant 0 : i32
    %c0_i32_0 = arith.constant 0 : i32
    %c0_i32_1 = arith.constant 0 : i32
    %c0_i32_2 = arith.constant 0 : i32
    return %c0_i32, %c0_i32_0, %c0_i32_1 : i32, i32, i32
  }
  func.func @transform_5(%arg0: i32) -> (i32, i32) {
    %c0_i32 = arith.constant 0 : i32
    %c0_i32_0 = arith.constant 0 : i32
    return %arg0, %c0_i32 : i32, i32
  }
}

</mosaic_0001>

<bundles_post_ra>
// kernel: tpu_custom_call.1
= control target key start
LH: loop header
LB: loop body
LE: loop exit
PB: predicated region body
PF: predicated region fallthrough
CT: control target
= control target key end

     0   :  { %10 = vsyncpa [#allocation3], 0  ;;  %s1725_s0 = inlined_call_operand.vmem [shape: f32[32,8], index: 0, kind: input, shape index: {}]   ;;  %s1726_s1 = inlined_call_operand.vmem [shape: bf16[8,128], index: 1, kind: input, shape index: {}]   ;;  %s1727_s2 = inlined_call_operand.vmem [shape: f32[1,128], index: 2, kind: input, shape index: {}]   ;;  %s1728_s3 = inlined_call_operand.hbm [shape: bf16[2,128,384], index: 3, kind: input, shape index: {}]   ;;  %s1729_s4 = inlined_call_operand.vmem [shape: f32[2,1,128], index: 4, kind: input, shape index: {}]   ;;  %s1730_s5 = inlined_call_operand.hbm [shape: f32[32,128], index: 5, kind: output, shape index: {}]  }
   0x1   :  { %11 = vsyncpa [#allocation4], 0 }
   0x2   :  { %13 = vsyncpa [#allocation4 + $0x1], 0  ;;  %s1492_s18 = smov 0   ;;  %s1494_s19 = smov 0  }
   0x3   :  { %s1496_s20 = smov 0   ;;  %s1498_s21 = smov 0  }
   0x4 LB: > { %s1513_s22 = sadd.s32 4294967295, %s1429_s21   ;;  %s1022_s23 = sadd.s32 4294967294, %s1429_s21   ;;  %s1429_s21 = sphi %s1498_s21, %s1750_s21   ;;  %s1425_s20 = sphi %s1496_s20, %s1749_s20   ;;  %s1421_s19 = sphi %s1494_s19, %s1748_s19   ;;  %s1417_s18 = sphi %s1492_s18, %s1747_s18  }
   0x5   : > { %s1517_s24 = sadd.s32 1, %s1429_s21   ;;  %s136_s25 = sadd.s32 1, %s1425_s20 }
   0x6   : > { %s133_s26 = ssub.s32 %s1429_s21, %s1517_s24  ;;  %p146_p0 = scmp.ne.s32.totalorder %s1425_s20, %s1421_s19 }
   0x7   : > { %p134_p1 = scmp.eq.s32.totalorder %s133_s26, 0  ;;  %p147_p2 = scmp.eq.s32.totalorder %s1513_s22, 1 }
   0x8   : > { %p152_p3 = scmp.ne.s32.totalorder %s1421_s19, %s1417_s18  ;;  %p153_p4 = scmp.eq.s32.totalorder %s1022_s23, 1 }
   0x9   : > { %s1528_s27 = scalar_select %p134_p1, %s1425_s20, %s136_s25  }
   0xa   : > { %p1530_p5 = por %p147_p2, %p146_p0  ;;  %p1534_p6 = por %p153_p4, %p152_p3 }
   0xb   : > { %p1023_p7 = scmp.ge.s32.totalorder %s1429_s21, 1  ;;  %p160_p8 = scmp.lt.s32.totalorder %s1429_s21, 3 }
   0xc   : > { %s1732_s29 = scalar_select %p1534_p6, 1, 0 }
   0xd   : > { %p1170_p9 = scmp.eq.s32.totalorder %s1513_s22, 0  ;;  %p1541_p10 = pnand %p1023_p7, %p160_p8 }
   0xe   : > { %s1451_s6 = smov [#allocation2]  }
   0xf   : > { %s178_s7 = sshll.u32 %s1451_s6, 4  ;;  %p1162_p11 = pneg %p1541_p10  ;;  %s179_s7 = int_to_ptr.vmem [resolvable:$true] %s178_s7 }
  0x10   : > { %s1330_s8 = scalar_lea.vmem %s179_s7, 6144  ;;  %p1338_p3 = scmp.lt.s32.totalorder %s179_s7, %s179_s7 }
  0x11   : > { %p1163_p12 = pnand %p1170_p9, %p1162_p11  ;;  %p1331_p0 = scmp.ne.s32.totalorder %s179_s7, %s1330_s8 }
  0x12   : > { %p1339_p4 = scmp.lt.s32.totalorder %s1330_s8, %s1330_s8 }
  0x13   : > { %p1321_p13 = pneg %p1163_p12 }
  0x14   : > { %p1340_p6 = por %p1339_p4, %p1338_p3 }
  0x15   : > { %p1333_p1 = pnand %p1331_p0, %p1321_p13 }
  0x17   : > { %p1334_p2 = pneg %p1333_p1 }
  0x19   : > { %p1341_p7 = pnand %p1340_p6, %p1334_p2 }
  0x1b   : > { %1344 = shalt.err (!%p1341_p7)
}
  0x1c   : > { %s1452_s9 = smov 192   ;;  %s1453_s10 = smov 12  }
  0x1d   : > { %1165 = dma.hbm_to_vmem [thread:$0]  (!%p1163_p12), %s1728_s3, 6144, %s179_s7, [#allocation3], %s1452_s9, %s1452_s9, %s1453_s10  }
  0x1e   : > { %206 = sbr.rel (%p1541_p10) target bundleno = 713 (0x2c9), region = 40 }
  0x23   : > { %1408 = dma.done.wait (%p1170_p9), [#allocation3], 6144  }
  0x24   : > { %1410 = vsyncadd (%p1170_p9), [#allocation3], 4294961152  ;;  %s231_s13 = sand.u32 1, %s1421_s19   ;;  %v1454_v0 = vmov 0.0   ;;  %vm1455_vm0 = vmmov 0   ;;  %s1029_s15 = sshll.u32 %s1513_s22, 1  ;;  %v302_v6 = vlaneseq }
  0x25   : > { %s1561_s14 = sshll.u32 %s231_s13, 4  ;;  %1110 = vmatprep.subr.bf16.mxu0 %v1454_v0  ;;  %1112 = vmatprep.mubr.msk.bf16.mxu0 %vm1455_vm0, %v1454_v0  ;;  %p235_p6 = scmp.lt.s32.totalorder %s1029_s15, 3  ;;  %vm257_vm1 = vcmask 1043456   ;;  %v245_v1 = vld [vmem:[%s1726_s1] sm:$0xf]  ;;  %vm253_vm2 = vcmask 64512  }
  0x26   : > { %v259_v2 = vsel %vm257_vm1, %v245_v1, 0  ;;  %v303_v7 = vshrl.u32 %v302_v6, 7  ;;  %v1031_v15 = vld [vmem:[%s1727_s2] ss:$0 sm:$0xff]  ;;  %s1590_s8 = scalar_lea.vmem [#allocation5], %s1561_s14  ;;  %s1600_s9 = smov 0  }
  0x27   : > { %s1752_s15 = smov (!%p235_p6, %s1029_s15), 3  ;;  %1111 = vmatpush3.bf16.msra.mxu0 %v259_v2 }
  0x28   : > { %s1030_s16 = sshll.u32 %s1752_s15, 3  ;;  %v304_v8 = vadd.s32 8, %v303_v7  ;;  %v309_v9 = vand.u32 15, %v303_v7 }
  0x29   : > { %s238_s30 = scalar_lea.vmem %s1725_s0, %s1030_s16 }
  0x2a   : > { %v242_v3 = vld [vmem:[%s238_s30] sm:$0xff]  ;;  %v243_v4 = vld [vmem:[%s238_s30 + $0x8] sm:$0xff]  ;;  %v316_v10 = vand.u32 15, %v304_v8  ;;  %vm1570_vm3 = vcmp.ge.s32.totalorder %v309_v9, 1  ;;  %vm1574_vm4 = vcmp.ge.s32.totalorder %v309_v9, 2 }
  0x2b   : > { %v244_v5 = vpack.c.bf16 %v243_v4, %v242_v3 }
  0x2c   : > { %vm1578_vm5 = vcmp.lt.s32.totalorder %v316_v10, 15  ;;  %vm1582_vm6 = vcmp.lt.s32.totalorder %v316_v10, 14 }
  0x2d   : > { %1113 = vmatmul.mubr.msk.bf16.vlgmr.msra.gmra.mxu0 %vm253_vm2, %v244_v5 }
  0xed   : > { %v295_v16 = vpop.f32.mrf.mxu0 }
  0xee   : > { %v296_v17 = vadd.f32 %v1031_v15, %v295_v16  }
  0xef   : > { %v1114_v18 = vpop.f32.mrf.mxu0 }
  0xf0   : > { %v1743_v23 = vmov %v296_v17 }
  0xf1   : > { %v298_v19 = vpop.f32.mrf.mxu0 }
  0xf2   : > { %v299_v20 = vadd.f32 %v1031_v15, %v298_v19  }
  0xf3   : > { %v1115_v21 = vpop.f32.mrf.mxu0 }
  0xf4   : > { %v1742_v22 = vmov %v299_v20 }
  0xf5 LB: >> { %v1255_v24 = vld [vmem:[#allocation2 + $0xac] ss:$12 sps:$4 sm:$0xff]   ;;  %v1456_v25 = vmov 0.0   ;;  %v1257_v26 = vld [vmem:[#allocation2 + $0xb0] ss:$12 sps:$4 sm:$0xff]   ;;  %vm1457_vm7 = vmmov 0   ;;  %v347_v52 = vpack.c.bf16 %v1433_v22, %v1437_v23  ;;  %s1449_s9 = sphi %s1600_s9, %s342_s9   ;;  %v1445_v17 = vphi %v296_v17, %v1745_v17   ;;  %v1441_v20 = vphi %v299_v20, %v1744_v20   ;;  %v1437_v23 = vphi %v1743_v23, %v911_v23   ;;  %v1433_v22 = vphi %v1742_v22, %v912_v22  }
  0xf6   : >> { %1116 = vmatprep.subr.bf16.mxu1 %v1456_v25  ;;  %1132 = vmatprep.mubr.msk.bf16.mxu1 %vm1457_vm7, %v1456_v25  ;;  %v1258_v27 = vld [vmem:[#allocation2 + $0xa8] ss:$12 sps:$4 sm:$0xff]   ;;  %v1458_v29 = vmov 0   ;;  %v1261_v30 = vld [vmem:[#allocation2 + $0x98] ss:$12 sps:$4 sm:$0xff]   ;;  %vm594_vm8 = vcmask 1040384  }
  0xf7   : >> { %508 = vmatprep.subr.bf16.mxu0 %v1255_v24  ;;  %1117 = vmatpush3.bf16.msra.mxu1 %v1257_v26  ;;  %v1259_v28 = vld [vmem:[#allocation2 + $0x94] ss:$12 sps:$4 sm:$0xff]   ;;  %v1262_v31 = vld [vmem:[#allocation2 + $0x90] ss:$12 sps:$4 sm:$0xff]   ;;  %v1266_v34 = vld [vmem:[#allocation2 + $0x78] ss:$12 sps:$4 sm:$0xff]  }
  0xf8   : >> { %540 = vmatprep.mubr.bf16.mxu0 %v1458_v29  ;;  %509 = vmatpush1.bf16.msra.mxu0 %v1258_v27  ;;  %v1263_v32 = vld [vmem:[#allocation2 + $0x7c] ss:$12 sps:$4 sm:$0xff]   ;;  %v1265_v33 = vld [vmem:[#allocation2 + $0x80] ss:$12 sps:$4 sm:$0xff]   ;;  %v1267_v35 = vld [vmem:[#allocation2 + $0x64] ss:$12 sps:$4 sm:$0xff]  }
  0xf9   : >> { %1118 = vmatprep.subr.bf16.mxu1 %v1456_v25  ;;  %510 = vmatprep.subr.bf16.mxu0 %v1259_v28  ;;  %v1269_v36 = vld [vmem:[#allocation2 + $0x68] ss:$12 sps:$4 sm:$0xff]   ;;  %v1270_v37 = vld [vmem:[#allocation2 + $0x60] ss:$12 sps:$4 sm:$0xff]   ;;  %v1273_v39 = vld [vmem:[#allocation2 + $0x50] ss:$12 sps:$4 sm:$0xff]  }
  0xfa   : >> { %v1271_v38 = vld [vmem:[#allocation2 + $0x4c] ss:$12 sps:$4 sm:$0xff]   ;;  %v1274_v40 = vld [vmem:[#allocation2 + $0x48] ss:$12 sps:$4 sm:$0xff]   ;;  %v1278_v43 = vld [vmem:[#allocation2 + $0x30] ss:$12 sps:$4 sm:$0xff]  }
  0xfb   : >> { %1119 = vmatpush3.bf16.msra.mxu1 %v1261_v30  ;;  %v1275_v41 = vld [vmem:[#allocation2 + $0x34] ss:$12 sps:$4 sm:$0xff]   ;;  %v1277_v42 = vld [vmem:[#allocation2 + $0x38] ss:$12 sps:$4 sm:$0xff]   ;;  %v1279_v44 = vld [vmem:[#allocation2 + $0x1c] ss:$12 sps:$4 sm:$0xff]  }
  0xfc   : >> { %511 = vmatpush1.bf16.msra.mxu0 %v1262_v31  ;;  %1120 = vmatprep.subr.bf16.mxu1 %v1456_v25  ;;  %v1281_v45 = vld [vmem:[#allocation2 + $0x20] ss:$12 sps:$4 sm:$0xff]   ;;  %v1282_v46 = vld [vmem:[#allocation2 + $0x18] ss:$12 sps:$4 sm:$0xff]   ;;  %v1285_v48 = vld [vmem:[#allocation2 + $0x8] ss:$12 sps:$4 sm:$0xff]  }
  0xfd   : >> { %512 = vmatprep.subr.bf16.mxu0 %v1263_v32  ;;  %v1283_v47 = vld [vmem:[#allocation2 + $0x4] ss:$12 sps:$4 sm:$0xff]   ;;  %v1286_v49 = vld [vmem:[#allocation2] ss:$12 sps:$4 sm:$0xff]   ;;  %v1287_v53 = vld [vmem:[#allocation2 + $0x168] ss:$12 sps:$4 sm:$0xff]  }
  0xfe   : >> { %v1289_v50 = vld [vmem:[#allocation2 + $0x16c] ss:$12 sps:$4 sm:$0xff]   ;;  %v1290_v51 = vld [vmem:[#allocation2 + $0x170] ss:$12 sps:$4 sm:$0xff]   ;;  %v1293_v54 = vld [vmem:[#allocation2 + $0x154] ss:$12 sps:$4 sm:$0xff]  }
  0xff   : >> { %1121 = vmatpush3.bf16.msra.mxu1 %v1265_v33  ;;  %v1294_v55 = vld [vmem:[#allocation2 + $0x158] ss:$12 sps:$4 sm:$0xff]   ;;  %v1291_v56 = vld [vmem:[#allocation2 + $0x150] ss:$12 sps:$4 sm:$0xff]   ;;  %v1298_v58 = vld [vmem:[#allocation2 + $0x140] ss:$12 sps:$4 sm:$0xff]  }
 0x100   : >> { %513 = vmatpush1.bf16.msra.mxu0 %v1266_v34  ;;  %1122 = vmatprep.subr.bf16.mxu1 %v1456_v25  ;;  %v1297_v57 = vld [vmem:[#allocation2 + $0x13c] ss:$12 sps:$4 sm:$0xff]   ;;  %v1295_v59 = vld [vmem:[#allocation2 + $0x138] ss:$12 sps:$4 sm:$0xff]   ;;  %v1299_v61 = vld [vmem:[#allocation2 + $0x120] ss:$12 sps:$4 sm:$0xff]  }
 0x101   : >> { %514 = vmatprep.subr.bf16.mxu0 %v1267_v35  ;;  %v1301_v60 = vld [vmem:[#allocation2 + $0x124] ss:$12 sps:$4 sm:$0xff]   ;;  %v1302_v62 = vld [vmem:[#allocation2 + $0x128] ss:$12 sps:$4 sm:$0xff]   ;;  %v1305_v63 = vld [vmem:[#allocation2 + $0x10c] ss:$12 sps:$4 sm:$0xff]  }
 0x102   : >> { %v1303_v0 = vld [vmem:[#allocation2 + $0x108] ss:$12 sps:$4 sm:$0xff]   ;;  %v1306_v1 = vld [vmem:[#allocation2 + $0x110] ss:$12 sps:$4 sm:$0xff]   ;;  %v1310_v4 = vld [vmem:[#allocation2 + $0xf8] ss:$12 sps:$4 sm:$0xff]  }
 0x103   : >> { %1123 = vmatpush3.bf16.msra.mxu1 %v1269_v36  ;;  %v1309_v2 = vld [vmem:[#allocation2 + $0xf4] ss:$12 sps:$4 sm:$0xff]   ;;  %v1307_v3 = vld [vmem:[#allocation2 + $0xf0] ss:$12 sps:$4 sm:$0xff]   ;;  %v1311_v6 = vld [vmem:[#allocation2 + $0xd8] ss:$12 sps:$4 sm:$0xff]  }
 0x104   : >> { %515 = vmatpush1.bf16.msra.mxu0 %v1270_v37  ;;  %1124 = vmatprep.subr.bf16.mxu1 %v1456_v25  ;;  %v1313_v5 = vld [vmem:[#allocation2 + $0xdc] ss:$12 sps:$4 sm:$0xff]   ;;  %v1314_v7 = vld [vmem:[#allocation2 + $0xe0] ss:$12 sps:$4 sm:$0xff]   ;;  %v1317_v8 = vld [vmem:[#allocation2 + $0xc4] ss:$12 sps:$4 sm:$0xff]  }
 0x105   : >> { %516 = vmatprep.subr.bf16.mxu0 %v1271_v38  ;;  %v1315_v9 = vld [vmem:[#allocation2 + $0xc0] ss:$12 sps:$4 sm:$0xff]   ;;  %v1318_v10 = vld [vmem:[#allocation2 + $0xc8] ss:$12 sps:$4 sm:$0xff]   ;;  %vm605_vm9 = vcmask 1046528   ;;  %vm877_vm10 = vcmask 1041408  }
 0x106   : >> { %v1057_v36 = vld [vmem:[%s1729_s4] ss:$0 sm:$0xff]  ;;  %vm888_vm11 = vcmask 1045504   ;;  %s342_s9 = sadd.s32 1, %s1449_s9  }
 0x107   : >> { %1125 = vmatpush3.bf16.msra.mxu1 %v1273_v39  ;;  %p339_p8 = scmp.ge.s32.totalorder %s342_s9, 2  }
 0x108   : >> { %517 = vmatpush1.bf16.msra.mxu0 %v1274_v40  ;;  %1126 = vmatprep.subr.bf16.mxu1 %v1456_v25  ;;  %s1089_s15 = sshll.u32 (%p339_p8), %s1513_s22, 8  ;;  %s931_s25 = sshll.u32 (%p339_p8), %s1590_s8, 4  ;;  %s1681_s25 = int_to_ptr.vmem [resolvable:$true] %s931_s25 }
 0x109   : >> { %518 = vmatprep.subr.bf16.mxu0 %v1275_v41  ;;  %s1678_s23 = scalar_lea.hbm (%p339_p8), %s1730_s5, %s1089_s15  ;;  %s1685_s26 = scalar_lea.sflag (%p339_p8), [#allocation4], %s231_s13 }
 0x10a   : > { %s1345_s30 = scalar_lea.vmem (%p339_p8), %s1681_s25, 256  ;;  %s1459_s22 = smov (%p339_p8), [#allocation5]  }
 0x10b   : >> { %1127 = vmatpush3.bf16.msra.mxu1 %v1277_v42  ;;  %p1346_p9 = scmp.ne.s32.totalorder (%p339_p8), %s1681_s25, %s1345_s30  ;;  %s1349_s6 = sshll.u32 (%p339_p8), %s1459_s22, 4  ;;  %s1350_s6 = int_to_ptr.vmem [resolvable:$false] %s1349_s6 }
 0x10c   : >> { %519 = vmatpush1.bf16.msra.mxu0 %v1278_v43  ;;  %1128 = vmatprep.subr.bf16.mxu1 %v1456_v25  ;;  %s1351_s7 = scalar_lea.vmem (%p339_p8), %s1350_s6, 512  ;;  %p1352_p12 = scmp.lt.s32.totalorder (%p339_p8), %s1681_s25, %s1350_s6 }
 0x10d   : >> { %520 = vmatprep.subr.bf16.mxu0 %v1279_v44  ;;  %p1347_p10 = pnand (%p339_p8), %p1346_p9, %p1530_p5  ;;  %p1353_p13 = scmp.lt.s32.totalorder (%p339_p8), %s1351_s7, %s1345_s30 }
 0x10f   : >> { %1129 = vmatpush3.bf16.msra.mxu1 %v1281_v45  ;;  %p1348_p11 = pneg (%p339_p8), %p1347_p10  ;;  %p1354_p0 = por (%p339_p8), %p1353_p13, %p1352_p12 }
 0x110   : >> { %521 = vmatpush1.bf16.msra.mxu0 %v1282_v46  ;;  %1130 = vmatprep.subr.bf16.mxu1 %v1456_v25 }
 0x111   : >> { %522 = vmatprep.subr.bf16.mxu0 %v1283_v47  ;;  %p1355_p1 = pnand (%p339_p8), %p1354_p0, %p1348_p11 }
 0x113   : >> { %1131 = vmatpush3.bf16.msra.mxu1 %v1285_v48 }
 0x114   : >> { %523 = vmatpush1.bf16.msra.mxu0 %v1286_v49  ;;  %1136 = vmatprep.subr.bf16.mxu1 %v1456_v25 }
 0x115   : >> { %791 = vmatprep.subr.bf16.mxu0 %v1289_v50 }
 0x116   : >> { %1133 = vmatmul.mubr.bf16.vlgmr.msra.gmra.mxu1 %v347_v52 }
 0x117   : >> { %541 = vmatmul.mubr.bf16.vlgmr.msra.gmra.mxu0 %v347_v52  ;;  %1137 = vmatpush3.bf16.msra.mxu1 %v1290_v51 }
 0x118   : >> { %792 = vmatpush1.bf16.msra.mxu0 %v1287_v53  ;;  %1138 = vmatprep.subr.bf16.mxu1 %v1456_v25 }
 0x119   : >> { %793 = vmatprep.subr.bf16.mxu0 %v1293_v54  ;;  %823 = vmatprep.mubr.bf16.mxu0 %v1458_v29 }
 0x11a   : >> { %1152 = vmatprep.mubr.msk.bf16.mxu1 %vm1457_vm7, %v1456_v25 }
 0x11b   : >> { %1139 = vmatpush3.bf16.msra.mxu1 %v1294_v55 }
 0x11c   : >> { %794 = vmatpush1.bf16.msra.mxu0 %v1291_v56  ;;  %1140 = vmatprep.subr.bf16.mxu1 %v1456_v25 }
 0x11d   : >> { %795 = vmatprep.subr.bf16.mxu0 %v1297_v57 }
 0x11f   : >> { %1141 = vmatpush3.bf16.msra.mxu1 %v1298_v58 }
 0x120   : >> { %796 = vmatpush1.bf16.msra.mxu0 %v1295_v59  ;;  %1142 = vmatprep.subr.bf16.mxu1 %v1456_v25 }
 0x121   : >> { %797 = vmatprep.subr.bf16.mxu0 %v1301_v60 }
 0x123   : >> { %1143 = vmatpush3.bf16.msra.mxu1 %v1302_v62 }
 0x124   : >> { %798 = vmatpush1.bf16.msra.mxu0 %v1299_v61  ;;  %1144 = vmatprep.subr.bf16.mxu1 %v1456_v25 }
 0x125   : >> { %799 = vmatprep.subr.bf16.mxu0 %v1305_v63  ;;  %v1083_v63 = vld [vmem:[%s1729_s4 + $0x1] ss:$0 sm:$0xff] }
 0x127   : >> { %1145 = vmatpush3.bf16.msra.mxu1 %v1306_v1 }
 0x128   : >> { %800 = vmatpush1.bf16.msra.mxu0 %v1303_v0  ;;  %1146 = vmatprep.subr.bf16.mxu1 %v1456_v25 }
 0x129   : >> { %801 = vmatprep.subr.bf16.mxu0 %v1309_v2 }
 0x12b   : >> { %1147 = vmatpush3.bf16.msra.mxu1 %v1310_v4 }
 0x12c   : >> { %802 = vmatpush1.bf16.msra.mxu0 %v1307_v3  ;;  %1148 = vmatprep.subr.bf16.mxu1 %v1456_v25 }
 0x12d   : >> { %803 = vmatprep.subr.bf16.mxu0 %v1313_v5 }
 0x12f   : >> { %1149 = vmatpush3.bf16.msra.mxu1 %v1314_v7 }
 0x130   : >> { %804 = vmatpush1.bf16.msra.mxu0 %v1311_v6  ;;  %1150 = vmatprep.subr.bf16.mxu1 %v1456_v25 }
 0x131   : >> { %805 = vmatprep.subr.bf16.mxu0 %v1317_v8 }
 0x133   : >> { %1151 = vmatpush3.bf16.msra.mxu1 %v1318_v10 }
 0x134   : >> { %806 = vmatpush1.bf16.msra.mxu0 %v1315_v9 }
 0x1d6   : >> { %v585_v15 = vpop.f32.mrf.mxu1 }
 0x1d7   : >> { %v542_v16 = vpop.f32.mrf.mxu0  ;;  %v606_v24 = vrot.slane %v585_v15, 1 }
 0x1d8   : >> { %v595_v18 = vrot.slane %v542_v16, 7  ;;  %v1134_v19 = vpop.f32.mrf.mxu1 }
 0x1d9   : >> { %v544_v21 = vpop.f32.mrf.mxu0 }
 0x1da   : >> { %v600_v22 = vsel %vm594_vm8, 0.0, %v595_v18  ;;  %v588_v23 = vpop.f32.mrf.mxu1 }
 0x1db   : >> { %v601_v26 = vsel %vm1570_vm3, %v600_v22, 0.0  ;;  %v607_v25 = vrot.slane %v588_v23, 1  ;;  %v546_v27 = vpop.f32.mrf.mxu0 }
 0x1dc   : >> { %v614_v28 = vadd.f32 %v601_v26, %v544_v21  ;;  %v596_v29 = vrot.slane %v546_v27, 7  ;;  %v1135_v30 = vpop.f32.mrf.mxu1 }
 0x1dd   : >> { %v608_v31 = vsel %vm605_vm9, %v606_v24, %v607_v25  ;;  %v611_v32 = vsel %vm605_vm9, %v607_v25, 0.0  ;;  %v548_v33 = vpop.f32.mrf.mxu0 }
 0x1de   : >> { %v616_v34 = vadd.f32 %v614_v28, %v608_v31  ;;  %v597_v35 = vsel %vm594_vm8, %v595_v18, %v596_v29  ;;  %v613_v38 = vsel %vm1578_vm5, %v611_v32, 0.0 }
 0x1df   : >> { %v615_v37 = vadd.f32 %v597_v35, %v548_v33 }
 0x1e0   : >> { %v625_v40 = vadd.f32 %v1057_v36, %v616_v34 }
 0x1e1   : >> { %v617_v39 = vadd.f32 %v615_v37, %v613_v38 }
 0x1e2   : >> { %v627_v42 = vmax.f32 %v625_v40, 0.0 }
 0x1e3   : >> { %v626_v41 = vadd.f32 %v1057_v36, %v617_v39 }
 0x1e5   : >> { %v628_v43 = vmax.f32 %v626_v41, 0.0 }
 0x1e7   : >> { %v629_v44 = vpack.c.bf16 %v628_v43, %v627_v42 }
 0x1e9   : >> { %824 = vmatmul.mubr.bf16.vlgmr.msra.gmra.mxu0 %v629_v44  ;;  %1153 = vmatmul.mubr.bf16.vlgmr.msra.gmra.mxu1 %v629_v44 }
 0x2a9   : >> { %v825_v45 = vpop.f32.mrf.mxu0  ;;  %v868_v46 = vpop.f32.mrf.mxu1 }
 0x2aa   : >> { %v878_v47 = vrot.slane %v825_v45, 6  ;;  %v889_v54 = vrot.slane %v868_v46, 2 }
 0x2ab   : >> { %v827_v48 = vpop.f32.mrf.mxu0  ;;  %v1154_v49 = vpop.f32.mrf.mxu1 }
 0x2ac   : >> { %v883_v50 = vsel %vm877_vm10, 0.0, %v878_v47 }
 0x2ad   : >> { %v884_v51 = vsel %vm1574_vm4, %v883_v50, 0.0  ;;  %v829_v52 = vpop.f32.mrf.mxu0  ;;  %v871_v53 = vpop.f32.mrf.mxu1 }
 0x2ae   : >> { %v897_v55 = vadd.f32 %v884_v51, %v827_v48  ;;  %v879_v56 = vrot.slane %v829_v52, 6  ;;  %v890_v57 = vrot.slane %v871_v53, 2 }
 0x2af   : >> { %v831_v58 = vpop.f32.mrf.mxu0  ;;  %v1155_v59 = vpop.f32.mrf.mxu1 }
 0x2b0   : >> { %v891_v60 = vsel %vm888_vm11, %v889_v54, %v890_v57  ;;  %v894_v61 = vsel %vm888_vm11, %v890_v57, 0.0  ;;  %v880_v62 = vsel %vm877_vm10, %v878_v47, %v879_v56 }
 0x2b1   : >> { %v896_v0 = vsel %vm1582_vm6, %v894_v61, 0.0  ;;  %v899_v1 = vadd.f32 %v897_v55, %v891_v60  ;;  %v898_v2 = vadd.f32 %v880_v62, %v831_v58 }
 0x2b3   : >> { %v900_v3 = vadd.f32 %v898_v2, %v896_v0  ;;  %v909_v4 = vadd.f32 %v1083_v63, %v899_v1 }
 0x2b5   : >> { %v910_v5 = vadd.f32 %v1083_v63, %v900_v3  ;;  %v911_v23 = vmax.f32 %v909_v4, 0.0  }
 0x2b7   : >> { %v912_v22 = vmax.f32 %v910_v5, 0.0   ;;  %v913_v6 = vadd.f32 %v1445_v17, %v911_v23   ;;  %341 = sbr.rel (!%p339_p8) target bundleno = 245 (0xf5), region = 89 }
 0x2b9   : >> { %v914_v7 = vadd.f32 %v1441_v20, %v912_v22   ;;  %v1745_v17 = vmov %v913_v6  ;;  %915 = vst [vmem:[%s1590_s8] sm:$0xff] (%p339_p8), %v913_v6 }
 0x2bb   : >> { %v1744_v20 = vmov %v914_v7  ;;  %916 = vst [vmem:[%s1590_s8 + $0x8] sm:$0xff] (%p339_p8), %v914_v7 }
 0x2bc   : > { %1358 = shalt.err (!%p1355_p1)
}
 0x2bd   : > { %s1359_s13 = scalar_lea.hbm %s1678_s23, 256  ;;  %s1363_s10 = scalar_lea.hbm %s1730_s5, 512 }
 0x2be   : > { %p1360_p2 = scmp.ne.s32.totalorder %s1678_s23, %s1359_s13  ;;  %p1364_p7 = scmp.lt.s32.totalorder %s1678_s23, %s1730_s5 }
 0x2bf   : > { %p1365_p6 = scmp.lt.s32.totalorder %s1363_s10, %s1359_s13 }
 0x2c0   : > { %p1361_p3 = pnand %p1360_p2, %p1530_p5 }
 0x2c1   : > { %p1366_p8 = por %p1365_p6, %p1364_p7 }
 0x2c2   : > { %p1362_p4 = pneg %p1361_p3 }
 0x2c4   : > { %p1367_p9 = pnand %p1366_p8, %p1362_p4 }
 0x2c6   : > { %1370 = shalt.err (!%p1367_p9)
}
 0x2c7   : > { %s1460_s14 = smov 128   ;;  %s1461_s15 = smov 8  }
 0x2c8   : > { %1160 = dma.vmem_to_hbm [thread:$0]  (%p1530_p5), %s1681_s25, 256, %s1678_s23, %s1685_s26, %s1460_s14, %s1460_s14, %s1461_s15  }
 0x2c9 PF: > { %p1172_p10 = scmp.ge.s32.totalorder %s1429_s21, 2  ;;  %s946_s16 = sand.u32 1, %s1417_s18  }
 0x2ca   : > { %p1746_p11 = scmp.ne.s32.totalorder %s1732_s29, 0  ;;  %s947_s17 = scalar_lea.sflag [#allocation4], %s946_s16 }
 0x2cc   : > { %p1167_p12 = pnand %p1172_p10, %p1746_p11 }
 0x2ce   : > { %p1168_p13 = pneg %p1167_p12 }
 0x2d0   : > { %1412 = dma.done.wait (%p1168_p13), %s947_s17, 256  }
 0x2d1   : > { %1414 = vsyncadd (%p1168_p13), %s947_s17, 4294967040  ;;  %p16_p0 = scmp.ge.s32.totalorder %s1517_s24, 4   ;;  %s1747_s18 = smov %s1421_s19 }
 0x2d2   : > { %s1748_s19 = smov %s1425_s20  ;;  %s1749_s20 = smov %s1528_s27 }
 0x2d3   : > { %s1750_s21 = smov %s1517_s24  ;;  %18 = sbr.rel (!%p16_p0) target bundleno = 4 (0x4), region = 100 }
 0x2d8   :  { %952 = vsyncpa [#allocation3], 1 }
 0x2d9   :  { %954 = vsyncpa [#allocation3 + $0x1], 1 }
 0x2da   :  { %955 = vsyncpa [#allocation4], 1 }
 0x2db   :  { %957 = vsyncpa [#allocation4 + $0x1], 1 }

</bundles_post_ra>
